<compile_context>
chip_gen: v7x
topology: tpu7x:2x2x1
jax: 0.10.0
libtpu: 0.0.40
codegen_flags: <defaults>
</compile_context>

<pallas_src>
import functools
import math

import jax
import jax.numpy as jnp
from jax import lax
from jax.experimental import pallas as pl
from jax.experimental.pallas import tpu as pltpu

_LANE = 128
_BLOCK_BYTES = 2 << 20       # ~2 MiB per input block per pipeline buffer
_VMEM_LIMIT = 32 << 20       # explicit scoped-VMEM limit (fits v5e..v7x)


def _round_up(v, m):
    return ((v + m - 1) // m) * m


@functools.lru_cache(maxsize=None)
def _num_tensorcores():
    """2 reduction segments on multi-TensorCore devices (v7x, v4/v5p megacore),
    1 on single-TC v5e/v6e (no duplicate blocks, no second epilogue)."""
    try:
        kind = jax.devices()[0].device_kind.lower()
    except Exception:
        return 1
    if "7" in kind or "v4" in kind or "v5p" in kind or kind.strip().endswith("v5"):
        return 2
    return 1


def _block_rows(*dtypes):
    """Largest 32-aligned row count whose (rows, 128) block stays ~2 MiB.
    32-row alignment keeps bf16/int8 inputs packed-sublane aligned."""
    itemsize = max(jnp.dtype(d).itemsize for d in dtypes)
    return max(32, (_BLOCK_BYTES // (_LANE * itemsize)) // 32 * 32)


# ---------------------------------------------------------------------------
# Primary path: x, y, masked all the same (flattened) shape.
# ---------------------------------------------------------------------------
def _l1_same_shape_kernel(x_ref, y_ref, m_ref, num_ref, den_ref,
                          acc_ref, macc_ref, *, n_rows, tm, n_blocks,
                          blocks_per_core, ragged):
    c = pl.program_id(0)          # core-split axis ("parallel")
    s = pl.program_id(1)          # reduction steps within a core ("arbitrary")

    @pl.when(s == 0)
    def _():
        acc_ref[...] = jnp.zeros_like(acc_ref)
        macc_ref[...] = jnp.zeros_like(macc_ref)

    global_block = c * blocks_per_core + s

    def _accumulate(mask_rows):
        x = x_ref[...].astype(jnp.float32)
        y = y_ref[...].astype(jnp.float32)
        m = m_ref[...].astype(jnp.float32)
        d = jnp.abs((x - y) * m)                      # == |x*m - y*m|
        if mask_rows:
            rows = global_block * tm + lax.broadcasted_iota(
                jnp.int32, (tm, _LANE), 0)
            valid = rows < n_rows
            # Select on the final addend: padded garbage (even NaN/Inf) drops.
            d = jnp.where(valid, d, 0.0)
            m = jnp.where(valid, m, 0.0)
        # One-vreg accumulators: leading-axis tree sum = pure VPU vreg adds,
        # only an (8,128) accumulator load/store per step.
        acc_ref[...] += d.reshape(-1, 8, _LANE).sum(axis=0)
        macc_ref[...] += m.reshape(-1, 8, _LANE).sum(axis=0)

    full_limit = n_blocks - 1 if ragged else n_blocks

    @pl.when(global_block < full_limit)        # interior blocks: no masking
    def _():
        _accumulate(False)

    if ragged:
        @pl.when(global_block == n_blocks - 1)  # true ragged tail block only
        def _():
            _accumulate(True)
    # global_block >= n_blocks: clamped duplicate from the core split -> skip.

    @pl.when(s == pl.num_programs(1) - 1)
    def _():
        # One cross-lane reduce per core segment; tiny per-core output slots.
        num_ref[...] = jnp.sum(acc_ref[...]).reshape(1, 1, 1)
        den_ref[...] = jnp.sum(macc_ref[...]).reshape(1, 1, 1)


def _masked_l1_sums_2d(x2, y2, m2, n_rows):
    """(sum(|x-y|*m), sum(m)) over (n_rows, 128) same-shape slabs."""
    tm = min(_block_rows(x2.dtype, y2.dtype, m2.dtype), _round_up(n_rows, 32))
    n_blocks = pl.cdiv(n_rows, tm)
    ncores = min(_num_tensorcores(), n_blocks)
    blocks_per_core = pl.cdiv(n_blocks, ncores)
    ragged = (n_rows % tm) != 0

    def in_map(c, s):
        # Clamp so an overshooting core re-reads the last block; the kernel
        # skips its contribution entirely.
        return (jnp.minimum(c * blocks_per_core + s, n_blocks - 1), 0)

    in_spec = pl.BlockSpec((tm, _LANE), in_map)
    out_spec = pl.BlockSpec((1, 1, 1), lambda c, s: (c, 0, 0))

    kernel = functools.partial(
        _l1_same_shape_kernel, n_rows=n_rows, tm=tm, n_blocks=n_blocks,
        blocks_per_core=blocks_per_core, ragged=ragged)

    num, den = pl.pallas_call(
        kernel,
        out_shape=(jax.ShapeDtypeStruct((ncores, 1, 1), jnp.float32),
                   jax.ShapeDtypeStruct((ncores, 1, 1), jnp.float32)),
        grid_spec=pltpu.PrefetchScalarGridSpec(
            num_scalar_prefetch=0,
            grid=(ncores, blocks_per_core),
            in_specs=[in_spec, in_spec, in_spec],
            out_specs=(out_spec, out_spec),
            scratch_shapes=[pltpu.VMEM((8, _LANE), jnp.float32),
                            pltpu.VMEM((8, _LANE), jnp.float32)],
        ),
        compiler_params=pltpu.CompilerParams(
            # TODO(synk): confirm both v7x TCs engage; else pltpu.CORE_PARALLEL.
            dimension_semantics=("parallel", "arbitrary"),
            vmem_limit_bytes=_VMEM_LIMIT),
    )(x2, y2, m2)
    return jnp.sum(num), jnp.sum(den)


def _l1_sums_flat(x, y, masked):
    """(sum(|x-y|*m), sum(m)) for same-shape x, y, masked (any shape/size)."""
    n = x.size
    n_main = (n // _LANE) * _LANE
    xf, yf, mf = x.reshape(-1), y.reshape(-1), masked.reshape(-1)

    num = jnp.float32(0.0)
    den = jnp.float32(0.0)
    if n_main > 0:
        n_rows = n_main // _LANE
        x2 = (xf if n_main == n else xf[:n_main]).reshape(n_rows, _LANE)
        y2 = (yf if n_main == n else yf[:n_main]).reshape(n_rows, _LANE)
        m2 = (mf if n_main == n else mf[:n_main]).reshape(n_rows, _LANE)
        knum, kden = _masked_l1_sums_2d(x2, y2, m2, n_rows)
        num = num + knum
        den = den + kden
    if n_main < n:
        # <128-element tail: tiny wrapper-side sum (no whole-array pad copy).
        xt = xf[n_main:].astype(jnp.float32)
        yt = yf[n_main:].astype(jnp.float32)
        mt = mf[n_main:].astype(jnp.float32)
        num = num + jnp.sum(jnp.abs((xt - yt) * mt))
        den = den + jnp.sum(mt)
    return num, den


# ---------------------------------------------------------------------------
# Broadcast-mask path: x viewed as (outer, rep, inner), mask as (outer, inner).
# The mask is never materialized at x's size; its block stays resident across
# the rep (innermost) grid axis so it is DMA'd from HBM ~once, not rep times.
# ---------------------------------------------------------------------------
def _broadcast_decomposition(x_shape, m_shape):
    """Return (outer, rep, inner) if the mask broadcasts onto x along one
    contiguous run of axes, else None."""
    nd = len(x_shape)
    if len(m_shape) > nd:
        return None
    m_full = (1,) * (nd - len(m_shape)) + tuple(m_shape)
    bcast = []
    for i, (xs, ms) in enumerate(zip(x_shape, m_full)):
        if ms == xs or xs == 1:
            continue
        if ms == 1:
            bcast.append(i)
        else:
            return None
    if not bcast:
        return None
    lo, hi = bcast[0], bcast[-1]
    if any(m_full[i] != 1 for i in range(lo, hi + 1)):
        return None   # broadcast axes not a contiguous run
    outer = math.prod(x_shape[:lo])
    rep = math.prod(x_shape[lo:hi + 1])
    inner = math.prod(x_shape[hi + 1:])
    return outer, rep, inner


def _l1_bcast_kernel(x_ref, y_ref, m_ref, num_ref, den_ref, acc_ref, macc_ref,
                     *, tr, tmb, rep, inner_rows, ragged_rep, ragged_rows):
    o = pl.program_id(0)
    ib = pl.program_id(1)
    rb = pl.program_id(2)   # innermost: mask block index is constant across rb

    first = (o == 0) & (ib == 0) & (rb == 0)
    last = ((o == pl.num_programs(0) - 1)
            & (ib == pl.num_programs(1) - 1)
            & (rb == pl.num_programs(2) - 1))

    @pl.when(first)
    def _():
        acc_ref[...] = jnp.zeros_like(acc_ref)
        macc_ref[...] = jnp.zeros_like(macc_ref)

    def _accumulate(mask_tail):
        x = x_ref[...].astype(jnp.float32)          # (1, tr, tmb, 128)
        y = y_ref[...].astype(jnp.float32)
        m = m_ref[...].astype(jnp.float32)          # (1, tmb, 128)
        d = jnp.abs((x - y) * m[:, None, :, :])     # == |x*m - y*m|
        if mask_tail:
            shp = (1, tr, tmb, _LANE)
            rep_ok = (rb * tr + lax.broadcasted_iota(jnp.int32, shp, 1)) < rep
            row_ok = (ib * tmb + lax.broadcasted_iota(jnp.int32, shp, 2)) < inner_rows
            d = jnp.where(rep_ok & row_ok, d, 0.0)  # select the final addend
        acc_ref[...] += d.reshape(-1, 8, _LANE).sum(axis=0)

        # Count the mask (denominator) exactly once per (outer, inner-block):
        # only on the first rep step, matching torch.sum(masked).
        @pl.when(rb == 0)
        def _():
            mm = m
            if ragged_rows:
                row_ok2 = (ib * tmb + lax.broadcasted_iota(
                    jnp.int32, (1, tmb, _LANE), 1)) < inner_rows
                mm = jnp.where(row_ok2, mm, 0.0)
            macc_ref[...] += mm.reshape(-1, 8, _LANE).sum(axis=0)

    if ragged_rep or ragged_rows:
        full_rb = pl.num_programs(2) - (1 if ragged_rep else 0)
        full_ib = pl.num_programs(1) - (1 if ragged_rows else 0)
        interior = (rb < full_rb) & (ib < full_ib)

        @pl.when(interior)
        def _():
            _accumulate(False)

        @pl.when(jnp.logical_not(interior))
        def _():
            _accumulate(True)
    else:
        _accumulate(False)

    @pl.when(last)
    def _():
        num_ref[...] = jnp.sum(acc_ref[...]).reshape(1, 1)
        den_ref[...] = jnp.sum(macc_ref[...]).reshape(1, 1)


def _masked_l1_sums_bcast(x, y, masked, outer, rep, inner):
    inner_rows = inner // _LANE
    x4 = x.reshape(outer, rep, inner_rows, _LANE)
    y4 = y.reshape(outer, rep, inner_rows, _LANE)
    m3 = masked.reshape(outer, inner_rows, _LANE)

    row_cap = _block_rows(x.dtype, y.dtype)
    tmb = min(_round_up(inner_rows, 32), row_cap)
    tr = max(1, min(rep, row_cap // tmb))
    inner_blocks = pl.cdiv(inner_rows, tmb)
    rep_blocks = pl.cdiv(rep, tr)
    ragged_rows = (inner_rows % tmb) != 0
    ragged_rep = (rep % tr) != 0

    kernel = functools.partial(
        _l1_bcast_kernel, tr=tr, tmb=tmb, rep=rep, inner_rows=inner_rows,
        ragged_rep=ragged_rep, ragged_rows=ragged_rows)

    out_spec = pl.BlockSpec((1, 1), lambda o, ib, rb: (0, 0))
    num, den = pl.pallas_call(
        kernel,
        out_shape=(jax.ShapeDtypeStruct((1, 1), jnp.float32),
                   jax.ShapeDtypeStruct((1, 1), jnp.float32)),
        grid_spec=pltpu.PrefetchScalarGridSpec(
            num_scalar_prefetch=0,
            # rep is innermost: the mask block index (o, ib) is unchanged
            # across consecutive steps, so Pallas skips the mask re-DMA.
            grid=(outer, inner_blocks, rep_blocks),
            in_specs=[
                pl.BlockSpec((1, tr, tmb, _LANE), lambda o, ib, rb: (o, rb, ib, 0)),
                pl.BlockSpec((1, tr, tmb, _LANE), lambda o, ib, rb: (o, rb, ib, 0)),
                pl.BlockSpec((1, tmb, _LANE), lambda o, ib, rb: (o, ib, 0)),
            ],
            out_specs=(out_spec, out_spec),
            scratch_shapes=[pltpu.VMEM((8, _LANE), jnp.float32),
                            pltpu.VMEM((8, _LANE), jnp.float32)],
        ),
        compiler_params=pltpu.CompilerParams(
            # TODO(synk): add a CORE_PARALLEL core-split axis for v7x here too.
            dimension_semantics=("arbitrary", "arbitrary", "arbitrary"),
            vmem_limit_bytes=_VMEM_LIMIT),
    )(x4, y4, m3)
    return num[0, 0], den[0, 0]


# ---------------------------------------------------------------------------
# Public entry point.
# ---------------------------------------------------------------------------
@jax.jit
def l1_loss_masked_mean(x, y, masked):
    """sum(|x*masked - y*masked|) / sum(masked) — Pallas TPU implementation."""
    if masked.dtype == jnp.bool_:
        masked = masked.astype(jnp.float32)

    res_shape = jnp.broadcast_shapes(x.shape, y.shape, masked.shape)
    if x.shape != res_shape:
        x = jnp.broadcast_to(x, res_shape)
    if y.shape != res_shape:
        y = jnp.broadcast_to(y, res_shape)

    if masked.size == x.size:
        # Same effective shape: lane-dense flat path; denominator from kernel.
        num, den = _l1_sums_flat(x, y, masked.reshape(x.shape))
        return num / den

    # Broadcast mask (smaller than x). Denominator = sum of the ORIGINAL mask.
    dec = _broadcast_decomposition(x.shape, masked.shape)
    if dec is not None and dec[2] >= _LANE and dec[2] % _LANE == 0:
        outer, rep, inner = dec
        num, den = _masked_l1_sums_bcast(x, y, masked, outer, rep, inner)
        return num / den

    # Rare fallback: non-contiguous broadcast or lane-unaligned inner extent.
    # TODO(synk): avoid materializing the broadcast mask for these layouts too.
    den = jnp.sum(masked.astype(jnp.float32))
    num, _ = _l1_sums_flat(x, y, jnp.broadcast_to(masked, x.shape))
    return num / den


if __name__ == "__main__":
    key = jax.random.PRNGKey(0)
    k1, k2, k3 = jax.random.split(key, 3)

    N, C, H, W = 2, 4, 16, 16
    x = jax.random.normal(k1, (N, C, H, W), dtype=jnp.float32)
    y = jax.random.normal(k2, (N, C, H, W), dtype=jnp.float32)
    masked = jax.random.bernoulli(k3, p=0.5, shape=(N, C, H, W)).astype(jnp.float32)

    # 1) Same-shape mask (primary lane-dense path).
    loss = l1_loss_masked_mean(x, y, masked)
    jax.block_until_ready(loss)
    ref = jnp.sum(jnp.abs(x * masked - y * masked)) / jnp.sum(masked)
    assert jnp.allclose(loss, ref, rtol=1e-5, atol=1e-6), (loss, ref)

    # 2) Broadcastable (N,1,H,W) mask (non-materializing broadcast kernel).
    masked_b = jax.random.bernoulli(k3, p=0.5, shape=(N, 1, H, W)).astype(jnp.float32)
    loss_b = l1_loss_masked_mean(x, y, masked_b)
    jax.block_until_ready(loss_b)
    ref_b = jnp.sum(jnp.abs(x * masked_b - y * masked_b)) / jnp.sum(masked_b)
    assert jnp.allclose(loss_b, ref_b, rtol=1e-5, atol=1e-6), (loss_b, ref_b)

    # 3) Lane-unaligned size (head kernel + tiny wrapper tail, no pad copy).
    xu = jax.random.normal(k1, (5, 7, 11), dtype=jnp.float32)
    yu = jax.random.normal(k2, (5, 7, 11), dtype=jnp.float32)
    mu = jax.random.bernoulli(k3, p=0.5, shape=(5, 7, 11)).astype(jnp.float32)
    loss_u = l1_loss_masked_mean(xu, yu, mu)
    jax.block_until_ready(loss_u)
    ref_u = jnp.sum(jnp.abs(xu * mu - yu * mu)) / jnp.sum(mu)
    assert jnp.allclose(loss_u, ref_u, rtol=1e-5, atol=1e-6), (loss_u, ref_u)

    print("KERNEL_OK")
</pallas_src>

<mosaic_0001>
module attributes {stable_mosaic.version = 11 : i64} {
  func.func @_l1_same_shape_kernel(%arg0: i32, %arg1: i32, %arg2: memref<32x128xf32, #tpu.memory_space<vmem>>, %arg3: memref<32x128xf32, #tpu.memory_space<vmem>>, %arg4: memref<32x128xf32, #tpu.memory_space<vmem>>, %arg5: memref<1x1x1xf32, #tpu.memory_space<vmem>>, %arg6: memref<1x1x1xf32, #tpu.memory_space<vmem>>, %arg7: memref<8x128xf32, #tpu.memory_space<vmem>>, %arg8: memref<8x128xf32, #tpu.memory_space<vmem>>) attributes {dimension_semantics = [#tpu.dimension_semantics<parallel>, #tpu.dimension_semantics<arbitrary>], iteration_bounds = array<i64: 1, 1>, scalar_prefetch = 0 : i64, scratch_operands = 2 : i64, tpu.core_type = #tpu.core_type<tc>, window_params = [{transform_indices = @transform_0, window_bounds = array<i64: 32, 128>}, {transform_indices = @transform_1, window_bounds = array<i64: 32, 128>}, {transform_indices = @transform_2, window_bounds = array<i64: 32, 128>}, {transform_indices = @transform_3, window_bounds = array<i64: 1, 1, 1>}, {transform_indices = @transform_4, window_bounds = array<i64: 1, 1, 1>}]} {
    %c0_i32 = arith.constant 0 : i32
    %0 = arith.cmpi eq, %arg1, %c0_i32 : i32
    %1 = arith.extui %0 : i1 to i32
    %c0_i32_0 = arith.constant 0 : i32
    %2 = arith.cmpi ne, %1, %c0_i32_0 : i32
    scf.if %2 {
      %cst = arith.constant 0.000000e+00 : f32
      %14 = vector.broadcast %cst : f32 to vector<8x128xf32>
      %c0 = arith.constant 0 : index
      %c0_7 = arith.constant 0 : index
      %15 = vector.load %arg7[%c0, %c0_7] : memref<8x128xf32, #tpu.memory_space<vmem>>, vector<8x128xf32>
      tpu.vector_store %arg7[%c0, %c0_7], %14 {strides = array<i32>} : memref<8x128xf32, #tpu.memory_space<vmem>>, vector<8x128xf32>,
      %cst_8 = arith.constant 0.000000e+00 : f32
      %16 = vector.broadcast %cst_8 : f32 to vector<8x128xf32>
      %c0_9 = arith.constant 0 : index
      %c0_10 = arith.constant 0 : index
      %17 = vector.load %arg8[%c0_9, %c0_10] : memref<8x128xf32, #tpu.memory_space<vmem>>, vector<8x128xf32>
      tpu.vector_store %arg8[%c0_9, %c0_10], %16 {strides = array<i32>} : memref<8x128xf32, #tpu.memory_space<vmem>>, vector<8x128xf32>,
    } else {
    }
    %c1_i32 = arith.constant 1 : i32
    %3 = arith.muli %arg0, %c1_i32 : i32
    %4 = arith.addi %3, %arg1 : i32
    %c0_i32_1 = arith.constant 0 : i32
    %5 = arith.cmpi slt, %4, %c0_i32_1 : i32
    %6 = arith.extui %5 : i1 to i32
    %c0_i32_2 = arith.constant 0 : i32
    %7 = arith.cmpi ne, %6, %c0_i32_2 : i32
    scf.if %7 {
      %c0 = arith.constant 0 : index
      %c0_7 = arith.constant 0 : index
      %14 = vector.load %arg2[%c0, %c0_7] : memref<32x128xf32, #tpu.memory_space<vmem>>, vector<32x128xf32>
      %c0_8 = arith.constant 0 : index
      %c0_9 = arith.constant 0 : index
      %15 = vector.load %arg3[%c0_8, %c0_9] : memref<32x128xf32, #tpu.memory_space<vmem>>, vector<32x128xf32>
      %c0_10 = arith.constant 0 : index
      %c0_11 = arith.constant 0 : index
      %16 = vector.load %arg4[%c0_10, %c0_11] : memref<32x128xf32, #tpu.memory_space<vmem>>, vector<32x128xf32>
      %17 = arith.subf %14, %15 : vector<32x128xf32>
      %18 = arith.mulf %17, %16 : vector<32x128xf32>
      %19 = math.absf %18 : vector<32x128xf32>
      %c0_12 = arith.constant 0 : index
      %c0_13 = arith.constant 0 : index
      %20 = vector.load %arg7[%c0_12, %c0_13] : memref<8x128xf32, #tpu.memory_space<vmem>>, vector<8x128xf32>
      %21 = vector.shape_cast %19 : vector<32x128xf32> to vector<4x8x128xf32>
      %cst = arith.constant dense<0.000000e+00> : vector<8x128xf32>
      %22 = vector.multi_reduction <add>, %21, %cst [0] : vector<4x8x128xf32> to vector<8x128xf32>
      %23 = arith.addf %20, %22 : vector<8x128xf32>
      %c0_14 = arith.constant 0 : index
      %c0_15 = arith.constant 0 : index
      %24 = vector.load %arg7[%c0_14, %c0_15] : memref<8x128xf32, #tpu.memory_space<vmem>>, vector<8x128xf32>
      tpu.vector_store %arg7[%c0_14, %c0_15], %23 {strides = array<i32>} : memref<8x128xf32, #tpu.memory_space<vmem>>, vector<8x128xf32>,
      %c0_16 = arith.constant 0 : index
      %c0_17 = arith.constant 0 : index
      %25 = vector.load %arg8[%c0_16, %c0_17] : memref<8x128xf32, #tpu.memory_space<vmem>>, vector<8x128xf32>
      %26 = vector.shape_cast %16 : vector<32x128xf32> to vector<4x8x128xf32>
      %cst_18 = arith.constant dense<0.000000e+00> : vector<8x128xf32>
      %27 = vector.multi_reduction <add>, %26, %cst_18 [0] : vector<4x8x128xf32> to vector<8x128xf32>
      %28 = arith.addf %25, %27 : vector<8x128xf32>
      %c0_19 = arith.constant 0 : index
      %c0_20 = arith.constant 0 : index
      %29 = vector.load %arg8[%c0_19, %c0_20] : memref<8x128xf32, #tpu.memory_space<vmem>>, vector<8x128xf32>
      tpu.vector_store %arg8[%c0_19, %c0_20], %28 {strides = array<i32>} : memref<8x128xf32, #tpu.memory_space<vmem>>, vector<8x128xf32>,
    } else {
    }
    %c0_i32_3 = arith.constant 0 : i32
    %8 = arith.cmpi eq, %4, %c0_i32_3 : i32
    %9 = arith.extui %8 : i1 to i32
    %c0_i32_4 = arith.constant 0 : i32
    %10 = arith.cmpi ne, %9, %c0_i32_4 : i32
    scf.if %10 {
      %c0 = arith.constant 0 : index
      %c0_7 = arith.constant 0 : index
      %14 = vector.load %arg2[%c0, %c0_7] : memref<32x128xf32, #tpu.memory_space<vmem>>, vector<32x128xf32>
      %c0_8 = arith.constant 0 : index
      %c0_9 = arith.constant 0 : index
      %15 = vector.load %arg3[%c0_8, %c0_9] : memref<32x128xf32, #tpu.memory_space<vmem>>, vector<32x128xf32>
      %c0_10 = arith.constant 0 : index
      %c0_11 = arith.constant 0 : index
      %16 = vector.load %arg4[%c0_10, %c0_11] : memref<32x128xf32, #tpu.memory_space<vmem>>, vector<32x128xf32>
      %17 = arith.subf %14, %15 : vector<32x128xf32>
      %18 = arith.mulf %17, %16 : vector<32x128xf32>
      %19 = math.absf %18 : vector<32x128xf32>
      %c32_i32 = arith.constant 32 : i32
      %20 = arith.muli %4, %c32_i32 : i32
      %21 = tpu.iota {dimensions = array<i32: 0>} : vector<32x128xi32>
      %22 = vector.broadcast %20 : i32 to vector<32x128xi32>
      %23 = arith.addi %22, %21 : vector<32x128xi32>
      %c16_i32 = arith.constant 16 : i32
      %24 = vector.broadcast %c16_i32 : i32 to vector<32x128xi32>
      %25 = arith.cmpi slt, %23, %24 : vector<32x128xi32>
      %cst = arith.constant 0.000000e+00 : f32
      %26 = vector.broadcast %cst : f32 to vector<32x128xf32>
      %27 = arith.select %25, %19, %26 : vector<32x128xi1>, vector<32x128xf32>
      %cst_12 = arith.constant 0.000000e+00 : f32
      %28 = vector.broadcast %cst_12 : f32 to vector<32x128xf32>
      %29 = arith.select %25, %16, %28 : vector<32x128xi1>, vector<32x128xf32>
      %c0_13 = arith.constant 0 : index
      %c0_14 = arith.constant 0 : index
      %30 = vector.load %arg7[%c0_13, %c0_14] : memref<8x128xf32, #tpu.memory_space<vmem>>, vector<8x128xf32>
      %31 = vector.shape_cast %27 : vector<32x128xf32> to vector<4x8x128xf32>
      %cst_15 = arith.constant dense<0.000000e+00> : vector<8x128xf32>
      %32 = vector.multi_reduction <add>, %31, %cst_15 [0] : vector<4x8x128xf32> to vector<8x128xf32>
      %33 = arith.addf %30, %32 : vector<8x128xf32>
      %c0_16 = arith.constant 0 : index
      %c0_17 = arith.constant 0 : index
      %34 = vector.load %arg7[%c0_16, %c0_17] : memref<8x128xf32, #tpu.memory_space<vmem>>, vector<8x128xf32>
      tpu.vector_store %arg7[%c0_16, %c0_17], %33 {strides = array<i32>} : memref<8x128xf32, #tpu.memory_space<vmem>>, vector<8x128xf32>,
      %c0_18 = arith.constant 0 : index
      %c0_19 = arith.constant 0 : index
      %35 = vector.load %arg8[%c0_18, %c0_19] : memref<8x128xf32, #tpu.memory_space<vmem>>, vector<8x128xf32>
      %36 = vector.shape_cast %29 : vector<32x128xf32> to vector<4x8x128xf32>
      %cst_20 = arith.constant dense<0.000000e+00> : vector<8x128xf32>
      %37 = vector.multi_reduction <add>, %36, %cst_20 [0] : vector<4x8x128xf32> to vector<8x128xf32>
      %38 = arith.addf %35, %37 : vector<8x128xf32>
      %c0_21 = arith.constant 0 : index
      %c0_22 = arith.constant 0 : index
      %39 = vector.load %arg8[%c0_21, %c0_22] : memref<8x128xf32, #tpu.memory_space<vmem>>, vector<8x128xf32>
      tpu.vector_store %arg8[%c0_21, %c0_22], %38 {strides = array<i32>} : memref<8x128xf32, #tpu.memory_space<vmem>>, vector<8x128xf32>,
    } else {
    }
    %c0_i32_5 = arith.constant 0 : i32
    %11 = arith.cmpi eq, %arg1, %c0_i32_5 : i32
    %12 = arith.extui %11 : i1 to i32
    %c0_i32_6 = arith.constant 0 : i32
    %13 = arith.cmpi ne, %12, %c0_i32_6 : i32
    scf.if %13 {
      %c0 = arith.constant 0 : index
      %c0_7 = arith.constant 0 : index
      %14 = vector.load %arg7[%c0, %c0_7] : memref<8x128xf32, #tpu.memory_space<vmem>>, vector<8x128xf32>
      %15 = vector.shape_cast %14 : vector<8x128xf32> to vector<1x8x128xf32>
      %cst = arith.constant dense<0.000000e+00> : vector<1xf32>
      %16 = vector.multi_reduction <add>, %15, %cst [1, 2] : vector<1x8x128xf32> to vector<1xf32>
      %17 = vector.shape_cast %16 : vector<1xf32> to vector<1x1x1xf32>
      %18 = vector.extract %17[0, 0, 0] : f32 from vector<1x1x1xf32>
      %19 = vector.broadcast %18 : f32 to vector<1x1x1xf32>
      %c0_8 = arith.constant 0 : index
      %c0_9 = arith.constant 0 : index
      %c0_10 = arith.constant 0 : index
      %20 = vector.load %arg5[%c0_8, %c0_9, %c0_10] : memref<1x1x1xf32, #tpu.memory_space<vmem>>, vector<1x1x1xf32>
      tpu.vector_store %arg5[%c0_8, %c0_9, %c0_10], %19 {strides = array<i32>} : memref<1x1x1xf32, #tpu.memory_space<vmem>>, vector<1x1x1xf32>,
      %c0_11 = arith.constant 0 : index
      %c0_12 = arith.constant 0 : index
      %21 = vector.load %arg8[%c0_11, %c0_12] : memref<8x128xf32, #tpu.memory_space<vmem>>, vector<8x128xf32>
      %22 = vector.shape_cast %21 : vector<8x128xf32> to vector<1x8x128xf32>
      %cst_13 = arith.constant dense<0.000000e+00> : vector<1xf32>
      %23 = vector.multi_reduction <add>, %22, %cst_13 [1, 2] : vector<1x8x128xf32> to vector<1xf32>
      %24 = vector.shape_cast %23 : vector<1xf32> to vector<1x1x1xf32>
      %25 = vector.extract %24[0, 0, 0] : f32 from vector<1x1x1xf32>
      %26 = vector.broadcast %25 : f32 to vector<1x1x1xf32>
      %c0_14 = arith.constant 0 : index
      %c0_15 = arith.constant 0 : index
      %c0_16 = arith.constant 0 : index
      %27 = vector.load %arg6[%c0_14, %c0_15, %c0_16] : memref<1x1x1xf32, #tpu.memory_space<vmem>>, vector<1x1x1xf32>
      tpu.vector_store %arg6[%c0_14, %c0_15, %c0_16], %26 {strides = array<i32>} : memref<1x1x1xf32, #tpu.memory_space<vmem>>, vector<1x1x1xf32>,
    } else {
    }
    return
  }
  func.func @transform_0(%arg0: i32, %arg1: i32) -> (i32, i32) {
    %c1_i32 = arith.constant 1 : i32
    %0 = arith.muli %arg0, %c1_i32 : i32
    %1 = arith.addi %0, %arg1 : i32
    %c0_i32 = arith.constant 0 : i32
    %2 = arith.minsi %1, %c0_i32 : i32
    %c0_i32_0 = arith.constant 0 : i32
    %c0_i32_1 = arith.constant 0 : i32
    return %2, %c0_i32_0 : i32, i32
  }
  func.func @transform_1(%arg0: i32, %arg1: i32) -> (i32, i32) {
    %c1_i32 = arith.constant 1 : i32
    %0 = arith.muli %arg0, %c1_i32 : i32
    %1 = arith.addi %0, %arg1 : i32
    %c0_i32 = arith.constant 0 : i32
    %2 = arith.minsi %1, %c0_i32 : i32
    %c0_i32_0 = arith.constant 0 : i32
    %c0_i32_1 = arith.constant 0 : i32
    return %2, %c0_i32_0 : i32, i32
  }
  func.func @transform_2(%arg0: i32, %arg1: i32) -> (i32, i32) {
    %c1_i32 = arith.constant 1 : i32
    %0 = arith.muli %arg0, %c1_i32 : i32
    %1 = arith.addi %0, %arg1 : i32
    %c0_i32 = arith.constant 0 : i32
    %2 = arith.minsi %1, %c0_i32 : i32
    %c0_i32_0 = arith.constant 0 : i32
    %c0_i32_1 = arith.constant 0 : i32
    return %2, %c0_i32_0 : i32, i32
  }
  func.func @transform_3(%arg0: i32, %arg1: i32) -> (i32, i32, i32) {
    %c0_i32 = arith.constant 0 : i32
    %c0_i32_0 = arith.constant 0 : i32
    %c0_i32_1 = arith.constant 0 : i32
    return %arg0, %c0_i32, %c0_i32_0 : i32, i32, i32
  }
  func.func @transform_4(%arg0: i32, %arg1: i32) -> (i32, i32, i32) {
    %c0_i32 = arith.constant 0 : i32
    %c0_i32_0 = arith.constant 0 : i32
    %c0_i32_1 = arith.constant 0 : i32
    return %arg0, %c0_i32, %c0_i32_0 : i32, i32, i32
  }
}

</mosaic_0001>

<bundles_post_ra>
// kernel: l1_loss_masked_mean.1
= control target key start
LH: loop header
LB: loop body
LE: loop exit
PB: predicated region body
PF: predicated region fallthrough
CT: control target
= control target key end

     0   :  { %10 = vsyncpa [#allocation5], 0  ;;  %s453_s0 = inlined_call_operand.vmem [shape: f32[16,128], index: 0, kind: input, shape index: {}]   ;;  %s454_s1 = inlined_call_operand.vmem [shape: f32[16,128], index: 1, kind: input, shape index: {}]   ;;  %s455_s2 = inlined_call_operand.vmem [shape: f32[16,128], index: 2, kind: input, shape index: {}]   ;;  %s456_s3 = inlined_call_operand.hbm [shape: f32[1,1,1], index: 3, kind: output, shape index: {0}]   ;;  %s457_s4 = inlined_call_operand.hbm [shape: f32[1,1,1], index: 4, kind: output, shape index: {1}]  }
   0x1   :  { %v195_v0 = vld [vmem:[%s453_s0] sm:$0xff]  ;;  %v196_v1 = vld [vmem:[%s453_s0 + $0x8] sm:$0xff] }
   0x2   :  { %v199_v2 = vld [vmem:[%s454_s1] sm:$0xff]  ;;  %v200_v3 = vld [vmem:[%s454_s1 + $0x8] sm:$0xff] }
   0x3   :  { %v203_v4 = vld [vmem:[%s455_s2] sm:$0xff]  ;;  %v204_v5 = vld [vmem:[%s455_s2 + $0x8] sm:$0xff]  ;;  %v207_v6 = vsub.f32 %v195_v0, %v199_v2  ;;  %v208_v7 = vsub.f32 %v196_v1, %v200_v3 }
   0x4   :  { %11 = vsyncpa [#allocation7], 0  ;;  %v249_v13 = vadd.f32 %v204_v5, %v203_v4  ;;  %s382_s0 = smov [#allocation4]   ;;  %vm268_vm0 = vcmask 0   ;;  %s383_s27 = smov [#allocation6]  }
   0x5   :  { %v211_v8 = vmul.f32 %v207_v6, %v203_v4  ;;  %v212_v9 = vmul.f32 %v208_v7, %v204_v5  ;;  %s288_s1 = sshll.u32 %s382_s0, 4  ;;  %s298_s28 = sshll.u32 %s383_s27, 4  ;;  %s289_s1 = int_to_ptr.vmem [resolvable:$true] %s288_s1  ;;  %s299_s28 = int_to_ptr.vmem [resolvable:$true] %s298_s28 }
   0x6   :  { %s334_s29 = scalar_lea.vmem %s289_s1, 16  ;;  %s338_s30 = scalar_lea.vmem %s289_s1, 32 }
   0x7   :  { %v215_v10 = vand.u32 2147483647, %v211_v8  ;;  %v216_v11 = vand.u32 2147483647, %v212_v9  ;;  %p335_p0 = scmp.ne.s32.totalorder %s289_s1, %s334_s29  ;;  %p339_p1 = scmp.lt.s32.totalorder %s289_s1, %s289_s1 }
   0x8   :  { %p340_p2 = scmp.lt.s32.totalorder %s338_s30, %s334_s29 }
   0x9   :  { %v243_v12 = vadd.f32 %v216_v11, %v215_v10 }
   0xa   :  { %p341_p3 = por %p340_p2, %p339_p1 }
   0xb   :  { %258 = vadd.xlane.f32.xlu0 %v243_v12 }
   0xc   :  { %p342_p4 = pnand %p341_p3, %p335_p0 }
   0xf   :  { %271 = vadd.xlane.f32.xlu0 %v249_v13 }
  0x98   :  { %v259_v14 = vpop.xlane.xlu0 %258 }
  0x99   :  { %v260_v15 = vrot.slane %v259_v14, 4 }
  0x9b   :  { %v261_v16 = vadd.f32 %v260_v15, %v259_v14 }
  0x9c   :  { %v272_v17 = vpop.xlane.xlu0 %271 }
  0x9d   :  { %v262_v18 = vrot.slane %v261_v16, 2  ;;  %v273_v19 = vrot.slane %v272_v17, 4 }
  0x9f   :  { %v274_v20 = vadd.f32 %v273_v19, %v272_v17  ;;  %v263_v21 = vadd.f32 %v262_v18, %v261_v16 }
  0xa1   :  { %v275_v22 = vrot.slane %v274_v20, 2  ;;  %v264_v23 = vrot.slane %v263_v21, 1 }
  0xa3   :  { %v276_v24 = vadd.f32 %v275_v22, %v274_v20  ;;  %v265_v25 = vadd.f32 %v264_v23, %v263_v21 }
  0xa5   :  { %328 = vpush %v265_v25  ;;  %v277_v26 = vrot.slane %v276_v24, 1 }
  0xa7   :  { %v278_v27 = vadd.f32 %v277_v26, %v276_v24 }
  0xa9   :  { %330 = vpush %v278_v27 }
  0xd6   :  { %s329_s2 = spop %328 }
  0xd7   :  { %v267_v28 = vstv %s329_s2 }
  0xd8   :  { %269 = vst.msk [vmem:[#allocation4] sm:$0x1] %vm268_vm0, %v267_v28 }
  0xd9   :  { %345 = shalt.err (!%p342_p4)
}
  0xda   :  { %s346_s7 = scalar_lea.hbm %s456_s3, 16 }
  0xdb   :  { %p347_p5 = scmp.ne.s32.totalorder %s456_s3, %s346_s7  ;;  %p350_p6 = scmp.lt.u32.totalorder %s346_s7, %s456_s3 }
  0xdd   :  { %p352_p7 = pnand %p350_p6, %p347_p5 }
  0xdf   :  { %355 = shalt.err (!%p352_p7)
}
  0xe0   :  { %291 = dma.vmem_to_hbm [thread:$0]  %s289_s1, 16, %s456_s3, [#allocation5]  }
  0xe1   :  { %s331_s14 = spop %330  ;;  %s356_s15 = scalar_lea.vmem %s299_s28, 16 }
  0xe2   :  { %v280_v29 = vstv %s331_s14  ;;  %p357_p8 = scmp.ne.s32.totalorder %s299_s28, %s356_s15  ;;  %s360_s16 = scalar_lea.vmem %s299_s28, 32 }
  0xe3   :  { %281 = vst.msk [vmem:[#allocation6] sm:$0x1] %vm268_vm0, %v280_v29  ;;  %p361_p9 = scmp.lt.s32.totalorder %s299_s28, %s299_s28  ;;  %p362_p10 = scmp.lt.s32.totalorder %s360_s16, %s356_s15 }
  0xe5   :  { %p363_p11 = por %p362_p10, %p361_p9 }
  0xe7   :  { %p364_p12 = pnand %p363_p11, %p357_p8 }
  0xe9   :  { %367 = shalt.err (!%p364_p12)
}
  0xea   :  { %s368_s19 = scalar_lea.hbm %s457_s4, 16 }
  0xeb   :  { %p369_p13 = scmp.ne.s32.totalorder %s457_s4, %s368_s19  ;;  %p372_p0 = scmp.lt.u32.totalorder %s368_s19, %s457_s4 }
  0xed   :  { %p374_p1 = pnand %p372_p0, %p369_p13 }
  0xef   :  { %377 = shalt.err (!%p374_p1)
}
  0xf0   :  { %301 = dma.vmem_to_hbm [thread:$0]  %s299_s28, 16, %s457_s4, [#allocation7]  }
  0xf1   :  { %378 = dma.done.wait [#allocation5], 16  }
  0xf2   :  { %379 = vsyncadd [#allocation5], 4294967280 }
  0xf3   :  { %380 = dma.done.wait [#allocation7], 16  }
  0xf4   :  { %381 = vsyncadd [#allocation7], 4294967280 }
  0xf5   :  { %308 = vsyncpa [#allocation5], 1 }
  0xf6   :  { %309 = vsyncpa [#allocation7], 1 }

</bundles_post_ra>
